<compile_context>
chip_gen: v7x
topology: tpu7x:2x2x1
jax: 0.10.0
libtpu: 0.0.40
codegen_flags: <defaults>
</compile_context>

<pallas_src>
import jax
import jax.numpy as jnp
from jax.experimental import pallas as pl
from jax.experimental.pallas import tpu as pltpu


def _round_up(n, m):
    return ((n + m - 1) // m) * m


def mnist_kernel(x_ref, w1_ref, b1_ref, w2_ref, b2_ref, o_ref):
    # fc1: bf16 operands on the MXU, f32 accumulation; bias + ReLU in f32 (VPU).
    h = jnp.dot(x_ref[...], w1_ref[...], preferred_element_type=jnp.float32)
    h = jnp.maximum(h + b1_ref[...], 0.0)
    # fc2: cast hidden activations back to bf16 for the MXU, accumulate in f32.
    logits = jnp.dot(h.astype(jnp.bfloat16), w2_ref[...],
                     preferred_element_type=jnp.float32) + b2_ref[...]
    # log_softmax over dim=1 (last axis), numerically stable, all f32.
    # max/sum reductions -> XLU, exp/log -> EUP; both off the VALU/MXU path.
    m = jnp.max(logits, axis=-1, keepdims=True)
    s = logits - m
    lse = jnp.log(jnp.sum(jnp.exp(s), axis=-1, keepdims=True))
    o_ref[...] = (s - lse).astype(o_ref.dtype)


def mnist_forward(x, w1, b1, w2, b2, *, tb=512):
    """x: (B, 784) f32/bf16; w1: (784, 50); b1: (1, 50); w2: (50, 10); b2: (1, 10)."""
    B, D = x.shape
    H = w1.shape[1]
    O = w2.shape[1]

    # bf16 storage for bandwidth-heavy operands; biases stay f32.
    xb = x.astype(jnp.bfloat16)
    w1b = w1.astype(jnp.bfloat16)
    w2b = w2.astype(jnp.bfloat16)
    b1f = b1.astype(jnp.float32).reshape(1, H)
    b2f = b2.astype(jnp.float32).reshape(1, O)

    # Batch tile: multiple of 8 sublanes; pad batch so the grid divides evenly.
    TB = min(tb, _round_up(B, 8))
    Bp = _round_up(B, TB)
    if Bp != B:
        xb = jnp.pad(xb, ((0, Bp - B), (0, 0)))

    out = pl.pallas_call(
        mnist_kernel,
        out_shape=jax.ShapeDtypeStruct((Bp, O), jnp.float32),
        grid=(Bp // TB,),
        in_specs=[
            pl.BlockSpec((TB, D), lambda i: (i, 0)),   # x: tiled over batch (pipelined)
            pl.BlockSpec((D, H), lambda i: (0, 0)),    # w1: resident in VMEM
            pl.BlockSpec((1, H), lambda i: (0, 0)),    # b1: resident in VMEM
            pl.BlockSpec((H, O), lambda i: (0, 0)),    # w2: resident in VMEM
            pl.BlockSpec((1, O), lambda i: (0, 0)),    # b2: resident in VMEM
        ],
        out_specs=pl.BlockSpec((TB, O), lambda i: (i, 0)),
        compiler_params=pltpu.CompilerParams(
            dimension_semantics=("parallel",)),
    )(xb, w1b, b1f, w2b, b2f)
    return out[:B]


def init_params(key):
    # Deterministic init, PyTorch Linear-style uniform(-1/sqrt(fan_in), 1/sqrt(fan_in)).
    k1, k2, k3, k4 = jax.random.split(key, 4)
    in1, h, out = 28 * 28, 50, 10
    bound1 = 1.0 / jnp.sqrt(in1)
    bound2 = 1.0 / jnp.sqrt(h)
    w1 = jax.random.uniform(k1, (in1, h), jnp.float32, -bound1, bound1)
    b1 = jax.random.uniform(k2, (1, h), jnp.float32, -bound1, bound1)
    w2 = jax.random.uniform(k3, (h, out), jnp.float32, -bound2, bound2)
    b2 = jax.random.uniform(k4, (1, out), jnp.float32, -bound2, bound2)
    return w1, b1, w2, b2


if __name__ == "__main__":
    key = jax.random.PRNGKey(0)
    kx, kp = jax.random.split(key)
    B = 8
    x = jax.random.normal(kx, (B, 28 * 28), jnp.float32)
    w1, b1, w2, b2 = init_params(kp)

    y = mnist_forward(x, w1, b1, w2, b2)
    jax.block_until_ready(y)
    assert y.shape == (B, 10)

    # Reference 1: bf16-matched (same cast strategy as the kernel).
    xb = x.astype(jnp.bfloat16)
    w1b = w1.astype(jnp.bfloat16)
    w2b = w2.astype(jnp.bfloat16)
    h_ref = jnp.maximum(
        jnp.dot(xb, w1b, preferred_element_type=jnp.float32) + b1, 0.0)
    logits_ref = jnp.dot(h_ref.astype(jnp.bfloat16), w2b,
                         preferred_element_type=jnp.float32) + b2
    y_ref_bf16 = jax.nn.log_softmax(logits_ref, axis=1)
    assert jnp.allclose(y, y_ref_bf16, atol=1e-3, rtol=1e-3)

    # Reference 2: full f32 semantics of the original module (looser tolerance
    # because the kernel stores x/w1/w2 in bf16 for bandwidth).
    h32 = jnp.maximum(x @ w1 + b1, 0.0)
    y_ref_f32 = jax.nn.log_softmax(h32 @ w2 + b2, axis=1)
    assert jnp.allclose(y, y_ref_f32, atol=5e-2, rtol=5e-2)

    print("KERNEL_OK")
</pallas_src>

<mosaic_0001>
module attributes {stable_mosaic.version = 11 : i64} {
  func.func @mnist_kernel(%arg0: i32, %arg1: memref<8x784xbf16, #tpu.memory_space<vmem>>, %arg2: memref<784x50xbf16, #tpu.memory_space<vmem>>, %arg3: memref<1x50xf32, #tpu.memory_space<vmem>>, %arg4: memref<50x10xbf16, #tpu.memory_space<vmem>>, %arg5: memref<1x10xf32, #tpu.memory_space<vmem>>, %arg6: memref<8x10xf32, #tpu.memory_space<vmem>>) attributes {dimension_semantics = [#tpu.dimension_semantics<parallel>], iteration_bounds = array<i64: 1>, scalar_prefetch = 0 : i64, scratch_operands = 0 : i64, tpu.core_type = #tpu.core_type<tc>, window_params = [{transform_indices = @transform_0, window_bounds = array<i64: 8, 784>}, {pipeline_mode = #tpu.pipeline_mode<synchronous>, transform_indices = @transform_1, window_bounds = array<i64: 784, 50>}, {pipeline_mode = #tpu.pipeline_mode<synchronous>, transform_indices = @transform_2, window_bounds = array<i64: 1, 50>}, {pipeline_mode = #tpu.pipeline_mode<synchronous>, transform_indices = @transform_3, window_bounds = array<i64: 50, 10>}, {pipeline_mode = #tpu.pipeline_mode<synchronous>, transform_indices = @transform_4, window_bounds = array<i64: 1, 10>}, {transform_indices = @transform_5, window_bounds = array<i64: 8, 10>}]} {
    %c0 = arith.constant 0 : index
    %c0_0 = arith.constant 0 : index
    %0 = vector.load %arg1[%c0, %c0_0] : memref<8x784xbf16, #tpu.memory_space<vmem>>, vector<8x784xbf16>
    %c0_1 = arith.constant 0 : index
    %c0_2 = arith.constant 0 : index
    %1 = vector.load %arg2[%c0_1, %c0_2] : memref<784x50xbf16, #tpu.memory_space<vmem>>, vector<784x50xbf16>
    %cst = arith.constant dense<0.000000e+00> : vector<8x50xf32>
    %2 = tpu.matmul %0, %1, %cst {dimension_numbers = #tpu.dot_dimension_numbers<[1], [0], [0], [1], [0, 0, 1, 1], [], []>} : vector<8x784xbf16>, vector<784x50xbf16>, vector<8x50xf32> -> vector<8x50xf32>
    %c0_3 = arith.constant 0 : index
    %c0_4 = arith.constant 0 : index
    %3 = vector.load %arg3[%c0_3, %c0_4] : memref<1x50xf32, #tpu.memory_space<vmem>>, vector<1x50xf32>
    %4 = vector.broadcast %3 : vector<1x50xf32> to vector<8x50xf32>
    %5 = arith.addf %2, %4 : vector<8x50xf32>
    %cst_5 = arith.constant 0.000000e+00 : f32
    %6 = vector.broadcast %cst_5 : f32 to vector<8x50xf32>
    %7 = arith.maximumf %5, %6 : vector<8x50xf32>
    %8 = arith.truncf %7 : vector<8x50xf32> to vector<8x50xbf16>
    %c0_6 = arith.constant 0 : index
    %c0_7 = arith.constant 0 : index
    %9 = vector.load %arg4[%c0_6, %c0_7] : memref<50x10xbf16, #tpu.memory_space<vmem>>, vector<50x10xbf16>
    %cst_8 = arith.constant dense<0.000000e+00> : vector<8x10xf32>
    %10 = tpu.matmul %8, %9, %cst_8 {dimension_numbers = #tpu.dot_dimension_numbers<[1], [0], [0], [1], [0, 0, 1, 1], [], []>} : vector<8x50xbf16>, vector<50x10xbf16>, vector<8x10xf32> -> vector<8x10xf32>
    %c0_9 = arith.constant 0 : index
    %c0_10 = arith.constant 0 : index
    %11 = vector.load %arg5[%c0_9, %c0_10] : memref<1x10xf32, #tpu.memory_space<vmem>>, vector<1x10xf32>
    %12 = vector.broadcast %11 : vector<1x10xf32> to vector<8x10xf32>
    %13 = arith.addf %10, %12 : vector<8x10xf32>
    %cst_11 = arith.constant dense<0xFF800000> : vector<8xf32>
    %14 = vector.multi_reduction <maximumf>, %13, %cst_11 [1] : vector<8x10xf32> to vector<8xf32>
    %15 = vector.shape_cast %14 : vector<8xf32> to vector<8x1xf32>
    %16 = vector.broadcast %15 : vector<8x1xf32> to vector<8x10xf32>
    %17 = arith.subf %13, %16 : vector<8x10xf32>
    %18 = math.exp %17 : vector<8x10xf32>
    %cst_12 = arith.constant dense<0.000000e+00> : vector<8xf32>
    %19 = vector.multi_reduction <add>, %18, %cst_12 [1] : vector<8x10xf32> to vector<8xf32>
    %20 = vector.shape_cast %19 : vector<8xf32> to vector<8x1xf32>
    %21 = math.log %20 : vector<8x1xf32>
    %22 = vector.broadcast %21 : vector<8x1xf32> to vector<8x10xf32>
    %23 = arith.subf %17, %22 : vector<8x10xf32>
    %c0_13 = arith.constant 0 : index
    %c0_14 = arith.constant 0 : index
    %24 = vector.load %arg6[%c0_13, %c0_14] : memref<8x10xf32, #tpu.memory_space<vmem>>, vector<8x10xf32>
    tpu.vector_store %arg6[%c0_13, %c0_14], %23 {strides = array<i32>} : memref<8x10xf32, #tpu.memory_space<vmem>>, vector<8x10xf32>,
    return
  }
  func.func @transform_0(%arg0: i32) -> (i32, i32) {
    %c0_i32 = arith.constant 0 : i32
    %c0_i32_0 = arith.constant 0 : i32
    return %arg0, %c0_i32 : i32, i32
  }
  func.func @transform_1(%arg0: i32) -> (i32, i32) {
    %c0_i32 = arith.constant 0 : i32
    %c0_i32_0 = arith.constant 0 : i32
    %c0_i32_1 = arith.constant 0 : i32
    return %c0_i32, %c0_i32_0 : i32, i32
  }
  func.func @transform_2(%arg0: i32) -> (i32, i32) {
    %c0_i32 = arith.constant 0 : i32
    %c0_i32_0 = arith.constant 0 : i32
    %c0_i32_1 = arith.constant 0 : i32
    return %c0_i32, %c0_i32_0 : i32, i32
  }
  func.func @transform_3(%arg0: i32) -> (i32, i32) {
    %c0_i32 = arith.constant 0 : i32
    %c0_i32_0 = arith.constant 0 : i32
    %c0_i32_1 = arith.constant 0 : i32
    return %c0_i32, %c0_i32_0 : i32, i32
  }
  func.func @transform_4(%arg0: i32) -> (i32, i32) {
    %c0_i32 = arith.constant 0 : i32
    %c0_i32_0 = arith.constant 0 : i32
    %c0_i32_1 = arith.constant 0 : i32
    return %c0_i32, %c0_i32_0 : i32, i32
  }
  func.func @transform_5(%arg0: i32) -> (i32, i32) {
    %c0_i32 = arith.constant 0 : i32
    %c0_i32_0 = arith.constant 0 : i32
    return %arg0, %c0_i32 : i32, i32
  }
}

</mosaic_0001>

<bundles_post_ra>
// kernel: tpu_custom_call.1
= control target key start
LH: loop header
LB: loop body
LE: loop exit
PB: predicated region body
PF: predicated region fallthrough
CT: control target
= control target key end

     0   :  { %v972_v43 = vmov 0.0   ;;  %vm973_vm0 = vmmov 0   ;;  %vm449_vm1 = vcmask 130048   ;;  %s1199_s0 = inlined_call_operand.vmem [shape: bf16[8,784], index: 0, kind: input, shape index: {}]   ;;  %s1200_s1 = inlined_call_operand.vmem [shape: bf16[784,50], index: 1, kind: input, shape index: {}]   ;;  %s1201_s2 = inlined_call_operand.vmem [shape: f32[1,50], index: 2, kind: input, shape index: {}]   ;;  %s1202_s3 = inlined_call_operand.vmem [shape: bf16[50,10], index: 3, kind: input, shape index: {}]   ;;  %s1203_s4 = inlined_call_operand.vmem [shape: f32[1,10], index: 4, kind: input, shape index: {}]   ;;  %s1204_s5 = inlined_call_operand.hbm [shape: f32[8,10], index: 5, kind: output, shape index: {}]  }
   0x1   :  { %v884_v0 = vld [vmem:[%s1200_s1 + $0x40] sm:$0xff]   ;;  %v888_v4 = vld [vmem:[%s1200_s1 + $0x48] sm:$0xff]   ;;  %v892_v8 = vld [vmem:[%s1200_s1 + $0x50] sm:$0xff]  }
   0x2   :  { %v885_v1 = vld [vmem:[%s1200_s1] sm:$0xff]   ;;  %790 = vmatprep.subr.bf16.mxu0 %v884_v0  ;;  %v889_v5 = vld [vmem:[%s1200_s1 + $0x8] sm:$0xff]   ;;  %v893_v9 = vld [vmem:[%s1200_s1 + $0x10] sm:$0xff]  }
   0x3   :  { %v886_v2 = vld [vmem:[%s1200_s1 + $0xc0] sm:$0xff]   ;;  %791 = vmatpush3.bf16.msra.mxu0 %v885_v1  ;;  %v890_v6 = vld [vmem:[%s1200_s1 + $0xc8] sm:$0xff]   ;;  %v894_v10 = vld [vmem:[%s1200_s1 + $0xd0] sm:$0xff]  }
   0x4   :  { %v887_v3 = vld [vmem:[%s1200_s1 + $0x80] sm:$0xff]   ;;  %812 = vmatprep.subr.bf16.mxu1 %v886_v2  ;;  %792 = vmatprep.subr.bf16.mxu0 %v888_v4  ;;  %v891_v7 = vld [vmem:[%s1200_s1 + $0x88] sm:$0xff]   ;;  %v895_v11 = vld [vmem:[%s1200_s1 + $0x90] sm:$0xff]  }
   0x5   :  { %813 = vmatpush3.bf16.msra.mxu1 %v887_v3  ;;  %v896_v12 = vld [vmem:[%s1200_s1 + $0x58] sm:$0xff]   ;;  %v900_v16 = vld [vmem:[%s1200_s1 + $0x60] sm:$0xff]   ;;  %v904_v20 = vld [vmem:[%s1200_s1 + $0x68] sm:$0xff]  }
   0x6   :  { %814 = vmatprep.subr.bf16.mxu1 %v890_v6  ;;  %v897_v13 = vld [vmem:[%s1200_s1 + $0x18] sm:$0xff]   ;;  %v901_v17 = vld [vmem:[%s1200_s1 + $0x20] sm:$0xff]   ;;  %v905_v21 = vld [vmem:[%s1200_s1 + $0x28] sm:$0xff]  }
   0x7   :  { %793 = vmatpush3.bf16.msra.mxu0 %v889_v5  ;;  %v898_v14 = vld [vmem:[%s1200_s1 + $0xd8] sm:$0xff]   ;;  %v902_v18 = vld [vmem:[%s1200_s1 + $0xe0] sm:$0xff]   ;;  %v906_v22 = vld [vmem:[%s1200_s1 + $0xe8] sm:$0xff]  }
   0x8   :  { %794 = vmatprep.subr.bf16.mxu0 %v892_v8  ;;  %v899_v15 = vld [vmem:[%s1200_s1 + $0x98] sm:$0xff]   ;;  %v903_v19 = vld [vmem:[%s1200_s1 + $0xa0] sm:$0xff]   ;;  %v907_v23 = vld [vmem:[%s1200_s1 + $0xa8] sm:$0xff]  }
   0x9   :  { %815 = vmatpush3.bf16.msra.mxu1 %v891_v7  ;;  %v908_v24 = vld [vmem:[%s1200_s1 + $0x70] sm:$0xff]   ;;  %v912_v28 = vld [vmem:[%s1200_s1 + $0x78] sm:$0xff]   ;;  %v22_v31 = vld [vmem:[%s1199_s0] sm:$0xff] }
   0xa   :  { %816 = vmatprep.subr.bf16.mxu1 %v894_v10  ;;  %v909_v25 = vld [vmem:[%s1200_s1 + $0x30] sm:$0xff]   ;;  %v913_v29 = vld [vmem:[%s1200_s1 + $0x38] sm:$0xff]   ;;  %v727_v32 = vcombine.low %v22_v31, %v22_v31  ;;  %v728_v33 = vcombine.high %v22_v31, %v22_v31  ;;  %v918_v35 = vld [vmem:[%s1200_s1 + $0x140] sm:$0xff]  }
   0xb   :  { %795 = vmatpush3.bf16.msra.mxu0 %v893_v9  ;;  %v910_v26 = vld [vmem:[%s1200_s1 + $0xf0] sm:$0xff]   ;;  %v914_v30 = vld [vmem:[%s1200_s1 + $0xf8] sm:$0xff]   ;;  %v23_v36 = vld [vmem:[%s1199_s0 + $0x8] sm:$0xff] }
   0xc   :  { %796 = vmatprep.subr.bf16.mxu0 %v896_v12  ;;  %v911_v27 = vld [vmem:[%s1200_s1 + $0xb0] sm:$0xff]   ;;  %v917_v34 = vld [vmem:[%s1200_s1 + $0xb8] sm:$0xff]   ;;  %485 = vmatprep.mubr.bf16.mxu0 %v728_v33  ;;  %v729_v37 = vcombine.low %v23_v36, %v23_v36  ;;  %v730_v38 = vcombine.high %v23_v36, %v23_v36  ;;  %v921_v39 = vld [vmem:[%s1200_s1 + $0x100] sm:$0xff]  }
   0xd   :  { %817 = vmatpush3.bf16.msra.mxu1 %v895_v11  ;;  %v922_v40 = vld [vmem:[%s1200_s1 + $0x148] sm:$0xff]   ;;  %v924_v42 = vld [vmem:[%s1200_s1 + $0x150] sm:$0xff]   ;;  %v926_v45 = vld [vmem:[%s1200_s1 + $0x158] sm:$0xff]  }
   0xe   :  { %818 = vmatprep.subr.bf16.mxu1 %v898_v14  ;;  %525 = vmatprep.mubr.bf16.mxu1 %v730_v38  ;;  %v923_v41 = vld [vmem:[%s1200_s1 + $0x108] sm:$0xff]   ;;  %v925_v44 = vld [vmem:[%s1200_s1 + $0x110] sm:$0xff]   ;;  %v927_v46 = vld [vmem:[%s1200_s1 + $0x118] sm:$0xff]  }
   0xf   :  { %797 = vmatpush3.bf16.msra.mxu0 %v897_v13  ;;  %v928_v47 = vld [vmem:[%s1200_s1 + $0x160] sm:$0xff]   ;;  %v930_v49 = vld [vmem:[%s1200_s1 + $0x168] sm:$0xff]   ;;  %v24_v51 = vld [vmem:[%s1199_s0 + $0x10] sm:$0xff] }
  0x10   :  { %798 = vmatprep.subr.bf16.mxu0 %v900_v16  ;;  %v929_v48 = vld [vmem:[%s1200_s1 + $0x120] sm:$0xff]   ;;  %v931_v52 = vld [vmem:[%s1200_s1 + $0x128] sm:$0xff]   ;;  %v732_v53 = vcombine.high %v24_v51, %v24_v51  ;;  %v939_v54 = vld [vmem:[%s1199_s0 + $0x18] ss:$0 sps:$4 sm:$0xff]  }
  0x11   :  { %819 = vmatpush3.bf16.msra.mxu1 %v899_v15  ;;  %v936_v50 = vld [vmem:[%s1200_s1 + $0x180] sm:$0xff]   ;;  %v932_v55 = vld [vmem:[%s1200_s1 + $0x170] sm:$0xff]  }
  0x12   :  { %820 = vmatprep.subr.bf16.mxu1 %v902_v18 }
  0x13   :  { %799 = vmatpush3.bf16.msra.mxu0 %v901_v17 }
  0x14   :  { %800 = vmatprep.subr.bf16.mxu0 %v904_v20 }
  0x15   :  { %821 = vmatpush3.bf16.msra.mxu1 %v903_v19 }
  0x16   :  { %822 = vmatprep.subr.bf16.mxu1 %v906_v22 }
  0x17   :  { %801 = vmatpush3.bf16.msra.mxu0 %v905_v21 }
  0x18   :  { %802 = vmatprep.subr.bf16.mxu0 %v908_v24 }
  0x19   :  { %823 = vmatpush3.bf16.msra.mxu1 %v907_v23 }
  0x1a   :  { %824 = vmatprep.subr.bf16.mxu1 %v910_v26 }
  0x1b   :  { %803 = vmatpush3.bf16.msra.mxu0 %v909_v25 }
  0x1c   :  { %804 = vmatprep.subr.bf16.mxu0 %v912_v28 }
  0x1d   :  { %825 = vmatpush3.bf16.msra.mxu1 %v911_v27 }
  0x1e   :  { %826 = vmatprep.subr.bf16.mxu1 %v914_v30 }
  0x1f   :  { %805 = vmatpush3.bf16.msra.mxu0 %v913_v29 }
  0x20   :  { %834 = vmatprep.subr.bf16.mxu0 %v918_v35 }
  0x21   :  { %827 = vmatpush3.bf16.msra.mxu1 %v917_v34 }
  0x22   :  { %486 = vmatmul.mubr.bf16.vlgmr.msra.gmra.mrb[0].mxu0 %v727_v32  ;;  %863 = vmatprep.subr.bf16.mxu1 %v972_v43 }
  0x23   :  { %835 = vmatpush3.bf16.msra.mxu0 %v921_v39  ;;  %565 = vmatprep.mubr.bf16.mxu0 %v732_v53 }
  0x24   :  { %526 = vmatmul.mubr.bf16.vlgmr.msra.gmra.mrb[0].mxu1 %v729_v37  ;;  %836 = vmatprep.subr.bf16.mxu0 %v922_v40 }
  0x25   :  { %865 = vmatprep.mubr.msk.bf16.mxu1 %vm973_vm0, %v972_v43  ;;  %864 = vmatpush3.bf16.msra.mxu1 %v936_v50 }
  0x26   :  { %869 = vmatprep.subr.bf16.mxu1 %v972_v43 }
  0x27   :  { %837 = vmatpush3.bf16.msra.mxu0 %v923_v41 }
  0x28   :  { %838 = vmatprep.subr.bf16.mxu0 %v924_v42 }
  0x2b   :  { %839 = vmatpush3.bf16.msra.mxu0 %v925_v44 }
  0x2c   :  { %840 = vmatprep.subr.bf16.mxu0 %v926_v45 }
  0x2f   :  { %841 = vmatpush3.bf16.msra.mxu0 %v927_v46 }
  0x30   :  { %842 = vmatprep.subr.bf16.mxu0 %v928_v47 }
  0x33   :  { %843 = vmatpush3.bf16.msra.mxu0 %v929_v48 }
  0x34   :  { %844 = vmatprep.subr.bf16.mxu0 %v930_v49 }
  0x35   :  { %10 = vsyncpa [#allocation3], 0  ;;  %866 = vmatmul.mubr.msk.bf16.vlgmr.msra.gmra.mrb[4].mxu1 %vm449_vm1, %v939_v54  ;;  %v933_v56 = vld [vmem:[%s1200_s1 + $0x130] sm:$0xff]   ;;  %v934_v57 = vld [vmem:[%s1200_s1 + $0x178] sm:$0xff]   ;;  %v731_v59 = vcombine.low %v24_v51, %v24_v51  ;;  %vm654_vm2 = vcmask 1040384   ;;  %vm650_vm3 = vcmask 408576  }
  0x36   :  { %877 = vmatprep.mubr.msk.bf16.mxu1 %vm973_vm0, %v972_v43  ;;  %v935_v58 = vld [vmem:[%s1200_s1 + $0x138] sm:$0xff]   ;;  %v940_v60 = vld [vmem:[%s1202_s3] sm:$0xff]   ;;  %v941_v61 = vld [vmem:[%s1202_s3 + $0x8] sm:$0xff]   ;;  %vm698_vm4 = vcmask 80896  }
  0x37   :  { %845 = vmatpush3.bf16.msra.mxu0 %v931_v52  ;;  %870 = vmatpush3.bf16.msra.mxu1 %v940_v60  ;;  %v942_v62 = vld [vmem:[%s1202_s3 + $0x10] sm:$0xff]   ;;  %v943_v63 = vld [vmem:[%s1202_s3 + $0x18] ss:$0 sps:$4 sm:$0x11]   ;;  %v726_v2 = vld [vmem:[%s1201_s2] ss:$0 sm:$0xff] }
  0x38   :  { %846 = vmatprep.subr.bf16.mxu0 %v932_v55  ;;  %871 = vmatprep.subr.bf16.mxu1 %v972_v43  ;;  %v656_v0 = vsel %vm654_vm2, %v943_v63, 0  ;;  %v784_v27 = vld [vmem:[%s1203_s4] ss:$0 sm:$0xff]  ;;  %s974_s4 = smov [#allocation2]  }
  0x39   :  { %s718_s7 = sshll.u32 %s974_s4, 4  ;;  %s719_s7 = int_to_ptr.vmem [resolvable:$true] %s718_s7 }
  0x3a   :  { %s948_s8 = scalar_lea.vmem %s719_s7, 128  ;;  %p953_p1 = scmp.lt.s32.totalorder %s719_s7, %s719_s7 }
  0x3b   :  { %847 = vmatpush3.bf16.msra.mxu0 %v933_v56  ;;  %872 = vmatpush3.bf16.msra.mxu1 %v941_v61  ;;  %p949_p0 = scmp.ne.s32.totalorder %s719_s7, %s948_s8  ;;  %p954_p2 = scmp.lt.s32.totalorder %s948_s8, %s948_s8 }
  0x3c   :  { %848 = vmatprep.subr.bf16.mxu0 %v934_v57  ;;  %873 = vmatprep.subr.bf16.mxu1 %v972_v43 }
  0x3d   :  { %p955_p3 = por %p954_p2, %p953_p1 }
  0x3f   :  { %849 = vmatpush3.bf16.msra.mxu0 %v935_v58  ;;  %874 = vmatpush3.bf16.msra.mxu1 %v942_v62  ;;  %p956_p4 = pnand %p955_p3, %p949_p0 }
  0x40   :  { %875 = vmatprep.subr.bf16.mxu1 %v972_v43 }
  0x42   :  { %566 = vmatmul.mubr.bf16.vlgmr.msra.gmra.mrb[4].mxu0 %v731_v59 }
  0x43   :  { %876 = vmatpush3.bf16.msra.mxu1 %v656_v0 }
  0xf5   :  { %v806_v1 = vpop.f32.mrb[0].mxu0 }
  0xf6   :  { %v807_v3 = vpop.f32.mrb[1].mxu0 }
  0xf7   :  { %v808_v4 = vadd.f32 %v807_v3, %v806_v1  ;;  %v809_v5 = vpop.f32.mrb[2].mxu0  ;;  %v828_v6 = vpop.f32.mrb[0].mxu1 }
  0xf8   :  { %v810_v7 = vpop.f32.mrb[3].mxu0  ;;  %v829_v8 = vpop.f32.mrb[1].mxu1 }
  0xf9   :  { %v488_v9 = vadd.f32 %v808_v4, %v726_v2  ;;  %v830_v10 = vadd.f32 %v829_v8, %v828_v6  ;;  %v831_v11 = vpop.f32.mrb[2].mxu1 }
  0xfa   :  { %v832_v12 = vpop.f32.mrb[3].mxu1 }
  0xfb   :  { %v528_v13 = vadd.f32 %v830_v10, %v488_v9 }
 0x108   :  { %v607_v14 = vpop.f32.mrb[4].mxu1 }
 0x109   :  { %v867_v15 = vpop.f32.mrb[5].mxu1 }
 0x10a   :  { %v610_v16 = vpop.f32.mrb[6].mxu1 }
 0x10b   :  { %v868_v17 = vpop.f32.mrb[7].mxu1 }
 0x115   :  { %v850_v18 = vpop.f32.mrb[4].mxu0 }
 0x116   :  { %v851_v19 = vpop.f32.mrb[5].mxu0 }
 0x117   :  { %v852_v20 = vadd.f32 %v851_v19, %v850_v18  ;;  %v853_v21 = vpop.f32.mrb[6].mxu0 }
 0x118   :  { %v854_v22 = vpop.f32.mrb[7].mxu0 }
 0x119   :  { %v568_v23 = vadd.f32 %v852_v20, %v528_v13 }
 0x11b   :  { %v608_v24 = vadd.f32 %v607_v14, %v568_v23 }
 0x11d   :  { %v613_v25 = vmax.f32 %v608_v24, 0.0 }
 0x11f   :  { %v614_v26 = vpack.c.bf16 %v613_v25, %v613_v25 }
 0x121   :  { %878 = vmatmul.mubr.msk.bf16.vlgmr.msra.gmra.mrb[8].mxu1 %vm650_vm3, %v614_v26 }
 0x1f4   :  { %v692_v28 = vpop.f32.mrb[8].mxu1 }
 0x1f5   :  { %v693_v29 = vadd.f32 %v784_v27, %v692_v28  ;;  %v879_v30 = vpop.f32.mrb[9].mxu1 }
 0x1f6   :  { %v695_v31 = vpop.f32.mrb[10].mxu1 }
 0x1f7   :  { %v880_v32 = vpop.f32.mrb[11].mxu1  ;;  %v699_v33 = vsel %vm698_vm4, %v693_v29, -inf }
 0x1f8   :  { %700 = vmax.xlane.f32.xlu0 %v699_v33 }
 0x285   :  { %v701_v34 = vpop.xlane.xlu0 %700 }
 0x286   :  { %v702_v35 = vsub.f32 %v693_v29, %v701_v34 }
 0x288   :  { %v703_v36 = vmul.f32 1.442695, %v702_v35 }
 0x28a   :  { %944 = vpow2.f32 %v703_v36 }
 0x294   :  { %v945_v37 = vpop.eup %944 }
 0x295   :  { %v705_v38 = vsel %vm698_vm4, %v945_v37, 0.0 }
 0x296   :  { %706 = vadd.xlane.f32.xlu0 %v705_v38 }
 0x323   :  { %v707_v39 = vpop.xlane.xlu0 %706 }
 0x324   :  { %946 = vlog2.f32 %v707_v39 }
 0x32e   :  { %v947_v40 = vpop.eup %946 }
 0x32f   :  { %v709_v41 = vmul.f32 0.6931472, %v947_v40 }
 0x331   :  { %v710_v42 = vsub.f32 %v702_v35, %v709_v41 }
 0x333   :  { %711 = vst.msk [vmem:[#allocation2] sm:$0xff] %vm698_vm4, %v710_v42 }
 0x334   :  { %959 = shalt.err (!%p956_p4)
}
 0x335   :  { %s960_s11 = scalar_lea.hbm %s1204_s5, 128 }
 0x336   :  { %p961_p5 = scmp.ne.s32.totalorder %s1204_s5, %s960_s11  ;;  %p964_p6 = scmp.lt.u32.totalorder %s960_s11, %s1204_s5 }
 0x338   :  { %p966_p7 = pnand %p964_p6, %p961_p5 }
 0x33a   :  { %969 = shalt.err (!%p966_p7)
}
 0x33b   :  { %721 = dma.vmem_to_hbm [thread:$0]  %s719_s7, 128, %s1204_s5, [#allocation3]  }
 0x33c   :  { %970 = dma.done.wait [#allocation3], 128  }
 0x33d   :  { %971 = vsyncadd [#allocation3], 4294967168 }
 0x33e   :  { %725 = vsyncpa [#allocation3], 1 }

</bundles_post_ra>
